<compile_context>
chip_gen: v7x
topology: tpu7x:2x2x1
jax: 0.10.0
libtpu: 0.0.40
codegen_flags: <defaults>
</compile_context>

<pallas_src>
import functools

import jax
import jax.numpy as jnp
from jax.experimental import pallas as pl
from jax.experimental.pallas import tpu as pltpu

_EPS = 1e-5


def _withbias_ln_kernel(x_ref, w_ref, b_ref, o_ref, *, apply_dtype):
    # x_ref block: (1, C, THW).  Normalize each spatial column over C.
    xin = x_ref[0]                                        # (C, THW), input dtype
    x32 = xin.astype(jnp.float32)
    # One-pass statistics, f32 accumulation over the C (sublane) axis.
    mu = jnp.mean(x32, axis=0, keepdims=True)             # (1, THW)
    ex2 = jnp.mean(x32 * x32, axis=0, keepdims=True)      # (1, THW)
    var = jnp.maximum(ex2 - mu * mu, 0.0)                 # guard cancellation
    inv = jax.lax.rsqrt(var + _EPS)                       # (1, THW)
    # Elementwise apply (bf16 on bf16-VPU chips, f32 otherwise).
    xa = xin.astype(apply_dtype)
    mu_a = mu.astype(apply_dtype)
    inv_a = inv.astype(apply_dtype)
    w = w_ref[...].astype(apply_dtype)                    # (C, 1), lane-broadcast
    b = b_ref[...].astype(apply_dtype)                    # (C, 1)
    o_ref[0] = ((xa - mu_a) * inv_a * w + b).astype(o_ref.dtype)


def _biasfree_ln_kernel(x_ref, w_ref, o_ref, *, apply_dtype):
    # BiasFree: variance uses the mean, but x itself is NOT mean-centered.
    # No `diff` temporary: var = E[x^2] - mu^2, y uses raw x.
    xin = x_ref[0]                                        # (C, THW)
    x32 = xin.astype(jnp.float32)
    mu = jnp.mean(x32, axis=0, keepdims=True)
    ex2 = jnp.mean(x32 * x32, axis=0, keepdims=True)
    var = jnp.maximum(ex2 - mu * mu, 0.0)
    inv = jax.lax.rsqrt(var + _EPS)
    xa = xin.astype(apply_dtype)
    w = w_ref[...].astype(apply_dtype)                    # (C, 1)
    o_ref[0] = (xa * inv.astype(apply_dtype) * w).astype(o_ref.dtype)


@functools.lru_cache(maxsize=1)
def _chip_tuning():
    """Trace-time chip query -> (vmem_limit_bytes, num_tensorcores, bf16_vpu)."""
    kind = ""
    try:
        kind = jax.devices()[0].device_kind.lower()
    except Exception:
        pass
    vmem_cap = None
    try:
        vmem_cap = int(pltpu.get_tpu_info().vmem_capacity_bytes)
    except Exception:
        vmem_cap = None
    is_v7 = "7" in kind                 # v7x: 64 MiB VMEM / TC, 2 TCs / chip
    is_v5 = "v5" in kind                # v5e: no bf16 VPU, 16 MiB scoped default
    if vmem_cap is None:
        vmem_cap = (64 if is_v7 else 128) * 1024 * 1024
    # >=32 MiB (load-bearing on v5e); ~48 MiB on 64 MiB parts; 64 MiB on 128 MiB parts.
    vmem_limit = min(64 * 1024 * 1024, max(32 * 1024 * 1024, (vmem_cap * 3) // 4))
    num_tc = 2 if is_v7 else 1
    bf16_vpu = not is_v5
    return int(vmem_limit), num_tc, bf16_vpu


def _pick_block_hw(hw, c, itemsize, max_block_hw, num_tc, batch):
    """Spatial tile width: ~4 MiB per block, multiple of 128, or full H*W."""
    target_bytes = 4 * 1024 * 1024
    thw = max(128, (target_bytes // max(1, c * itemsize)) // 128 * 128)
    if max_block_hw is not None:
        thw = min(thw, max(128, (max_block_hw // 128) * 128))
    if thw >= hw:
        # Single full-width block is always layout-legal, but on 2-TC chips
        # make sure the parallel grid has >=2 steps when batch is 1 so both
        # TensorCores get work.
        if num_tc >= 2 and batch == 1 and hw >= 256:
            half = (((hw + 1) // 2) + 127) // 128 * 128
            if half < hw:
                return int(half)
        return hw
    return int(thw)  # multiple of 128; ragged tail handled by cdiv grid


@functools.partial(jax.jit, static_argnames=("layernorm_type", "max_block_hw"))
def layer_norm_nchw(x, weight, bias=None, *, layernorm_type="WithBias",
                    max_block_hw=None):
    """Pallas forward of Shadowmamba LayerNorm.

    x      : [B, C, H, W]  (NCHW, like the PyTorch module)
    weight : [C]
    bias   : [C]  (ignored / may be None for 'BiasFree')
    """
    B, C, H, W = x.shape
    HW = H * W
    x3 = x.reshape(B, C, HW)                              # free, contiguous reshape
    itemsize = jnp.dtype(x.dtype).itemsize

    vmem_limit, num_tc, bf16_vpu = _chip_tuning()
    thw = _pick_block_hw(HW, C, itemsize, max_block_hw, num_tc, B)
    n_t = pl.cdiv(HW, thw)                                # ragged tail -> partial block

    # Stats always accumulate in f32; the apply pass runs in bf16 on chips with
    # a bf16 VPU (v6e/v7x) for bf16 inputs, f32 otherwise (f32 inputs, v5e).
    apply_dtype = (jnp.bfloat16
                   if (x.dtype == jnp.bfloat16 and bf16_vpu) else jnp.float32)

    w2 = weight.reshape(C, 1)

    # (1, C, THW): batch squeezed per step, full C on sublanes, H*W on lanes.
    # NOTE: for best sublane utilization C should be a multiple of 8.
    x_spec = pl.BlockSpec((1, C, thw), lambda b, t: (b, 0, t))
    out_spec = pl.BlockSpec((1, C, thw), lambda b, t: (b, 0, t))
    # Tiny per-channel params: whole array resident in VMEM, no per-step DMA.
    param_spec = pl.BlockSpec(memory_space=pltpu.MemorySpace.VMEM)

    compiler_params = pltpu.CompilerParams(
        dimension_semantics=("parallel", "parallel"),
        vmem_limit_bytes=vmem_limit,
    )
    # TODO(synk): optionally sweep pipeline_mode=pl.Buffered(3) on x_spec on
    # v7x if a profile shows exposed DMA gaps; default double-buffering here.

    if layernorm_type == "BiasFree":
        kernel = functools.partial(_biasfree_ln_kernel, apply_dtype=apply_dtype)
        out3 = pl.pallas_call(
            kernel,
            out_shape=jax.ShapeDtypeStruct((B, C, HW), x.dtype),
            grid_spec=pltpu.PrefetchScalarGridSpec(
                num_scalar_prefetch=0,
                grid=(B, n_t),
                in_specs=[x_spec, param_spec],
                out_specs=out_spec,
            ),
            compiler_params=compiler_params,
        )(x3, w2)
    else:
        b2 = bias.reshape(C, 1)
        kernel = functools.partial(_withbias_ln_kernel, apply_dtype=apply_dtype)
        out3 = pl.pallas_call(
            kernel,
            out_shape=jax.ShapeDtypeStruct((B, C, HW), x.dtype),
            grid_spec=pltpu.PrefetchScalarGridSpec(
                num_scalar_prefetch=0,
                grid=(B, n_t),
                in_specs=[x_spec, param_spec, param_spec],
                out_specs=out_spec,
            ),
            compiler_params=compiler_params,
        )(x3, w2, b2)

    return out3.reshape(B, C, H, W)                       # free reshape back to NCHW


def _reference_ln_nchw(x, weight, bias, layernorm_type="WithBias"):
    # Pure-JAX reference mirroring the PyTorch forward semantics (channel-last
    # LayerNorm after to_3d == per-pixel normalization over C in NCHW).
    mu = jnp.mean(x, axis=1, keepdims=True)
    var = jnp.mean((x - mu) ** 2, axis=1, keepdims=True)
    w = weight.reshape(1, -1, 1, 1)
    if layernorm_type == "BiasFree":
        return x / jnp.sqrt(var + 1e-5) * w
    b = bias.reshape(1, -1, 1, 1)
    return (x - mu) / jnp.sqrt(var + 1e-5) * w + b


if __name__ == "__main__":
    key = jax.random.PRNGKey(0)
    B, C, H, W = 2, 4, 16, 16
    x = jax.random.normal(key, (B, C, H, W), dtype=jnp.float32)

    # nn.Parameter(torch.ones(dim)) / torch.zeros(dim) equivalents, but use
    # non-trivial values so weight/bias application is actually checked.
    weight = jnp.ones((C,), dtype=jnp.float32) * 1.25
    bias = jnp.full((C,), 0.1, dtype=jnp.float32)

    # WithBias variant.
    out = jax.block_until_ready(
        layer_norm_nchw(x, weight, bias, layernorm_type="WithBias"))
    ref = _reference_ln_nchw(x, weight, bias, "WithBias")
    assert out.shape == (B, C, H, W)
    assert jnp.allclose(out, ref, atol=2e-5, rtol=2e-5)

    # BiasFree variant.
    out_bf = jax.block_until_ready(
        layer_norm_nchw(x, weight, None, layernorm_type="BiasFree"))
    ref_bf = _reference_ln_nchw(x, weight, bias, "BiasFree")
    assert jnp.allclose(out_bf, ref_bf, atol=2e-5, rtol=2e-5)

    # Ragged spatial extent: exercises the cdiv grid + partial tail block path
    # (H*W = 169 with a 128-wide spatial tile -> 2 tiles, last one partial).
    xr = jax.random.normal(jax.random.PRNGKey(1), (B, C, 13, 13), jnp.float32)
    out_r = jax.block_until_ready(
        layer_norm_nchw(xr, weight, bias, layernorm_type="WithBias",
                        max_block_hw=128))
    ref_r = _reference_ln_nchw(xr, weight, bias, "WithBias")
    assert jnp.allclose(out_r, ref_r, atol=2e-5, rtol=2e-5)

    print("KERNEL_OK")
</pallas_src>

<mosaic_0001>
module attributes {stable_mosaic.version = 11 : i64} {
  func.func @_withbias_ln_kernel(%arg0: i32, %arg1: i32, %arg2: memref<1x4x256xf32, #tpu.memory_space<vmem>>, %arg3: memref<4x1xf32, #tpu.memory_space<vmem>>, %arg4: memref<4x1xf32, #tpu.memory_space<vmem>>, %arg5: memref<1x4x256xf32, #tpu.memory_space<vmem>>) attributes {dimension_semantics = [#tpu.dimension_semantics<parallel>, #tpu.dimension_semantics<parallel>], iteration_bounds = array<i64: 2, 1>, scalar_prefetch = 0 : i64, scratch_operands = 0 : i64, tpu.core_type = #tpu.core_type<tc>, window_params = [{transform_indices = @transform_0, window_bounds = array<i64: 1, 4, 256>}, {pipeline_mode = #tpu.pipeline_mode<synchronous>, transform_indices = @transform_1, window_bounds = array<i64: 4, 1>}, {pipeline_mode = #tpu.pipeline_mode<synchronous>, transform_indices = @transform_2, window_bounds = array<i64: 4, 1>}, {transform_indices = @transform_3, window_bounds = array<i64: 1, 4, 256>}]} {
    %c0 = arith.constant 0 : index
    %c0_0 = arith.constant 0 : index
    %c0_1 = arith.constant 0 : index
    %0 = vector.load %arg2[%c0, %c0_0, %c0_1] : memref<1x4x256xf32, #tpu.memory_space<vmem>>, vector<1x4x256xf32>
    %1 = vector.shape_cast %0 : vector<1x4x256xf32> to vector<4x256xf32>
    %cst = arith.constant dense<0.000000e+00> : vector<256xf32>
    %2 = vector.multi_reduction <add>, %1, %cst [0] : vector<4x256xf32> to vector<256xf32>
    %3 = vector.shape_cast %2 : vector<256xf32> to vector<1x256xf32>
    %cst_2 = arith.constant 4.000000e+00 : f32
    %4 = vector.broadcast %cst_2 : f32 to vector<1x256xf32>
    %5 = arith.divf %3, %4 : vector<1x256xf32>
    %6 = arith.mulf %1, %1 : vector<4x256xf32>
    %cst_3 = arith.constant dense<0.000000e+00> : vector<256xf32>
    %7 = vector.multi_reduction <add>, %6, %cst_3 [0] : vector<4x256xf32> to vector<256xf32>
    %8 = vector.shape_cast %7 : vector<256xf32> to vector<1x256xf32>
    %cst_4 = arith.constant 4.000000e+00 : f32
    %9 = vector.broadcast %cst_4 : f32 to vector<1x256xf32>
    %10 = arith.divf %8, %9 : vector<1x256xf32>
    %11 = arith.mulf %5, %5 : vector<1x256xf32>
    %12 = arith.subf %10, %11 : vector<1x256xf32>
    %cst_5 = arith.constant 0.000000e+00 : f32
    %13 = vector.broadcast %cst_5 : f32 to vector<1x256xf32>
    %14 = arith.maximumf %12, %13 : vector<1x256xf32>
    %cst_6 = arith.constant 9.99999974E-6 : f32
    %15 = vector.broadcast %cst_6 : f32 to vector<1x256xf32>
    %16 = arith.addf %14, %15 : vector<1x256xf32>
    %17 = math.rsqrt %16 : vector<1x256xf32>
    %c0_7 = arith.constant 0 : index
    %c0_8 = arith.constant 0 : index
    %18 = vector.load %arg3[%c0_7, %c0_8] : memref<4x1xf32, #tpu.memory_space<vmem>>, vector<4x1xf32>
    %c0_9 = arith.constant 0 : index
    %c0_10 = arith.constant 0 : index
    %19 = vector.load %arg4[%c0_9, %c0_10] : memref<4x1xf32, #tpu.memory_space<vmem>>, vector<4x1xf32>
    %20 = vector.broadcast %5 : vector<1x256xf32> to vector<4x256xf32>
    %21 = arith.subf %1, %20 : vector<4x256xf32>
    %22 = vector.broadcast %17 : vector<1x256xf32> to vector<4x256xf32>
    %23 = arith.mulf %21, %22 : vector<4x256xf32>
    %24 = vector.broadcast %18 : vector<4x1xf32> to vector<4x256xf32>
    %25 = arith.mulf %23, %24 : vector<4x256xf32>
    %26 = vector.broadcast %19 : vector<4x1xf32> to vector<4x256xf32>
    %27 = arith.addf %25, %26 : vector<4x256xf32>
    %c0_11 = arith.constant 0 : index
    %c0_12 = arith.constant 0 : index
    %c0_13 = arith.constant 0 : index
    %28 = vector.load %arg5[%c0_11, %c0_12, %c0_13] : memref<1x4x256xf32, #tpu.memory_space<vmem>>, vector<1x4x256xf32>
    %29 = vector.shape_cast %28 : vector<1x4x256xf32> to vector<4x256xf32>
    %30 = vector.shape_cast %27 : vector<4x256xf32> to vector<1x4x256xf32>
    tpu.vector_store %arg5[%c0_11, %c0_12, %c0_13], %30 {strides = array<i32>} : memref<1x4x256xf32, #tpu.memory_space<vmem>>, vector<1x4x256xf32>,
    return
  }
  func.func @transform_0(%arg0: i32, %arg1: i32) -> (i32, i32, i32) {
    %c0_i32 = arith.constant 0 : i32
    %c0_i32_0 = arith.constant 0 : i32
    return %arg0, %c0_i32, %arg1 : i32, i32, i32
  }
  func.func @transform_1(%arg0: i32, %arg1: i32) -> (i32, i32) {
    %c0_i32 = arith.constant 0 : i32
    %c0_i32_0 = arith.constant 0 : i32
    %c0_i32_1 = arith.constant 0 : i32
    return %c0_i32, %c0_i32_0 : i32, i32
  }
  func.func @transform_2(%arg0: i32, %arg1: i32) -> (i32, i32) {
    %c0_i32 = arith.constant 0 : i32
    %c0_i32_0 = arith.constant 0 : i32
    %c0_i32_1 = arith.constant 0 : i32
    return %c0_i32, %c0_i32_0 : i32, i32
  }
  func.func @transform_3(%arg0: i32, %arg1: i32) -> (i32, i32, i32) {
    %c0_i32 = arith.constant 0 : i32
    %c0_i32_0 = arith.constant 0 : i32
    return %arg0, %c0_i32, %arg1 : i32, i32, i32
  }
}

</mosaic_0001>

<bundles_post_ra>
// kernel: layer_norm_nchw.1
= control target key start
LH: loop header
LB: loop body
LE: loop exit
PB: predicated region body
PF: predicated region fallthrough
CT: control target
= control target key end

     0   :  { %8 = vsyncpa [#allocation3], 0  ;;  %s1002_s0 = inlined_call_operand.hbm [shape: f32[2,4,256], index: 0, kind: input, shape index: {}]   ;;  %s1003_s1 = inlined_call_operand.hbm [shape: f32[4,1], index: 1, kind: input, shape index: {}]   ;;  %s1004_s2 = inlined_call_operand.hbm [shape: f32[4,1], index: 2, kind: input, shape index: {}]   ;;  %s1005_s3 = inlined_call_operand.hbm [shape: f32[2,4,256], index: 3, kind: output, shape index: {}]  }
   0x1   :  { %10 = vsyncpa [#allocation3 + $0x1], 0 }
   0x2   :  { %11 = vsyncpa [#allocation6], 0 }
   0x3   :  { %12 = vsyncpa [#allocation4], 0 }
   0x4   :  { %14 = vsyncpa [#allocation4 + $0x1], 0  ;;  %s755_s12 = smov 0   ;;  %s757_s13 = smov 0  }
   0x5   :  { %s759_s14 = smov 0   ;;  %s761_s15 = smov 0  }
   0x6   :  { %s763_s16 = smov 0   ;;  %s765_s17 = smov 0  }
   0x7 LB: > { %s443_s18 = sadd.s32 4294967295, %s727_s17   ;;  %s444_s19 = sadd.s32 4294967294, %s727_s17   ;;  %s727_s17 = sphi %s765_s17, %s20_s17   ;;  %s723_s16 = sphi %s763_s16, %s1028_s16   ;;  %s719_s15 = sphi %s761_s15, %s1027_s15   ;;  %s715_s14 = sphi %s759_s14, %s1026_s14   ;;  %s711_s13 = sphi %s757_s13, %s1025_s13   ;;  %s707_s12 = sphi %s755_s12, %s1024_s12  }
   0x8   : > { %p54_p0 = scmp.ne.s32.totalorder %s711_s13, %s707_s12  ;;  %p789_p1 = scmp.eq.s32.totalorder %s443_s18, 0 }
   0x9   : > { %p793_p2 = scmp.eq.s32.totalorder %s443_s18, 1  ;;  %p128_p3 = scmp.eq.s32.totalorder %s444_s19, 1 }
   0xa   : > { %s1010_s20 = scalar_select %p789_p1, 1, 0 }
   0xb   : > { %s1011_s21 = scalar_select %p793_p2, 1, 0 }
   0xc   : > { %p799_p4 = por %p789_p1, %p54_p0  ;;  %p445_p5 = scmp.ge.s32.totalorder %s727_s17, 1 }
   0xd   : > { %p804_p6 = por %p128_p3, %p54_p0  ;;  %p135_p7 = scmp.lt.s32.totalorder %s727_s17, 3 }
   0xe   : > { %s1012_s22 = scalar_select %p799_p4, 1, 0 }
   0xf   : > { %s1013_s23 = scalar_select %p804_p6, 1, 0 }
  0x10   : > { %p809_p8 = pnand %p445_p5, %p135_p7  ;;  %s729_s25 = smov [#allocation5]  }
  0x11   : > { %s148_s26 = sshll.u32 %s729_s25, 4  ;;  %s730_s27 = smov [#allocation7]   ;;  %s149_s26 = int_to_ptr.vmem [resolvable:$true] %s148_s26 }
  0x12   : > { %s1014_s24 = scalar_select %p809_p8, 1, 0 }
  0x13   : > { %p476_p10 = pneg %p809_p8  ;;  %s159_s28 = sshll.u32 %s730_s27, 4  ;;  %s822_s28 = int_to_ptr.vmem [resolvable:$true] %s159_s28 }
  0x14   : > { %s555_s5 = scalar_lea.hbm %s1003_s1, 64 }
  0x15   : > { %p818_p11 = pnand %p476_p10, %p789_p1  ;;  %p556_p12 = scmp.ne.s32.totalorder %s1003_s1, %s555_s5 }
  0x16   : > { %p562_p5 = scmp.lt.u32.totalorder %s555_s5, %s1003_s1 }
  0x17   : > { %p557_p13 = pneg %p818_p11 }
  0x19   : > { %p558_p0 = pnand %p557_p13, %p556_p12 }
  0x1b   : > { %p559_p3 = pneg %p558_p0 }
  0x1d   : > { %p564_p7 = pnand %p562_p5, %p559_p3 }
  0x1f   : > { %567 = shalt.err (!%p564_p7)
}
  0x20   : > { %s568_s10 = scalar_lea.vmem %s149_s26, 64  ;;  %p576_p1 = scmp.lt.s32.totalorder %s149_s26, %s149_s26 }
  0x21   : > { %p569_p10 = scmp.ne.s32.totalorder %s149_s26, %s568_s10  ;;  %p577_p4 = scmp.lt.s32.totalorder %s568_s10, %s568_s10 }
  0x23   : > { %p571_p9 = pnand %p569_p10, %p557_p13  ;;  %p578_p8 = por %p577_p4, %p576_p1 }
  0x25   : > { %p572_p6 = pneg %p571_p9 }
  0x27   : > { %p579_p2 = pnand %p578_p8, %p572_p6 }
  0x29   : > { %582 = shalt.err (!%p579_p2)
}
  0x2a   : > { %479 = dma.hbm_to_vmem [thread:$0]  (!%p818_p11), %s1003_s1, 64, %s149_s26, [#allocation6]  }
  0x2b   : > { %s583_s27 = scalar_lea.hbm %s1004_s2, 64 }
  0x2c   : > { %p584_p9 = scmp.ne.s32.totalorder %s1004_s2, %s583_s27  ;;  %p590_p2 = scmp.lt.u32.totalorder %s583_s27, %s1004_s2 }
  0x2e   : > { %p586_p1 = pnand %p584_p9, %p557_p13 }
  0x30   : > { %p587_p4 = pneg %p586_p1 }
  0x32   : > { %p592_p6 = pnand %p590_p2, %p587_p4 }
  0x34   : > { %595 = shalt.err (!%p592_p6)
}
  0x35   : > { %s596_s26 = scalar_lea.vmem %s822_s28, 64  ;;  %p604_p3 = scmp.lt.s32.totalorder %s822_s28, %s822_s28 }
  0x36   : > { %p597_p8 = scmp.ne.s32.totalorder %s822_s28, %s596_s26  ;;  %p605_p5 = scmp.lt.s32.totalorder %s596_s26, %s596_s26 }
  0x38   : > { %p599_p12 = pnand %p597_p8, %p557_p13  ;;  %p606_p7 = por %p605_p5, %p604_p3 }
  0x3a   : > { %p600_p0 = pneg %p599_p12 }
  0x3c   : > { %p607_p10 = pnand %p606_p7, %p600_p0 }
  0x3e   : > { %610 = shalt.err (!%p607_p10)
}
  0x3f   : > { %482 = dma.hbm_to_vmem [thread:$0]  (!%p818_p11), %s1004_s2, 64, %s822_s28, [#allocation6]  }
  0x40   : > { %s32_s9 = sadd.s32 1, %s723_s16  ;;  %s41_s10 = sadd.s32 1, %s715_s14 }
  0x41   : > { %p34_p13 = scmp.ge.s32.totalorder %s32_s9, 2  ;;  %p48_p9 = scmp.ne.s32.totalorder %s715_s14, %s711_s13 }
  0x42   : > { %p49_p1 = scmp.eq.s32.totalorder %s727_s17, 0  ;;  %p493_p4 = scmp.lt.s32.totalorder %s727_s17, 2 }
  0x43   : > { %s1030_s9 = smov (%p34_p13, %s32_s9), 0  ;;  %p1016_p6 = scmp.ne.s32.totalorder %s1011_s21, 0 }
  0x44   : > { %p50_p2 = por %p49_p1, %p48_p9  ;;  %s36_s11 = ssub.s32 %s723_s16, %s1030_s9 }
  0x45   : > { %p881_p8 = por %p1016_p6, %p48_p9  ;;  %s170_s18 = sand.u32 1, %s715_s14  }
  0x46   : > { %p39_p12 = scmp.eq.s32.totalorder %s36_s11, 0  ;;  %s449_s28 = sshll.u32 %s170_s18, 3 }
  0x47   : > { %s462_s19 = sshll.u32 %s723_s16, 7  ;;  %s174_s21 = scalar_lea.vmem [#allocation2], %s449_s28 }
  0x48   : > { %s890_s25 = scalar_select %p39_p12, %s715_s14, %s41_s10  }
  0x49   : > { %s895_s4 = scalar_lea.hbm %s1002_s0, %s462_s19  ;;  %s184_s5 = sshll.u32 %s174_s21, 4  ;;  %s903_s5 = int_to_ptr.vmem [resolvable:$true] %s184_s5 }
  0x4a   : > { %p899_p11 = pnand %p493_p4, %p50_p2  ;;  %s171_s26 = scalar_lea.sflag [#allocation3], %s170_s18 }
  0x4b   : > { %s611_s7 = scalar_lea.hbm %s895_s4, 128  ;;  %s616_s11 = scalar_lea.hbm %s1002_s0, 256 }
  0x4c   : > { %p612_p0 = scmp.ne.s32.totalorder %s895_s4, %s611_s7  ;;  %p613_p3 = pneg %p899_p11 }
  0x4d   : > { %p617_p10 = scmp.lt.u32.totalorder %s895_s4, %s1002_s0  ;;  %p618_p13 = scmp.lt.u32.totalorder %s616_s11, %s611_s7 }
  0x4e   : > { %p614_p5 = pnand %p613_p3, %p612_p0  ;;  %p620_p1 = scmp.lt.u32.totalorder %s611_s7, %s895_s4 }
  0x4f   : > { %p619_p9 = por %p618_p13, %p617_p10 }
  0x50   : > { %p615_p7 = pneg %p614_p5 }
  0x51   : > { %p621_p4 = por %p620_p1, %p619_p9 }
  0x53   : > { %p622_p2 = pnand %p621_p4, %p615_p7 }
  0x55   : > { %625 = shalt.err (!%p622_p2)
}
  0x56   : > { %s626_s18 = scalar_lea.vmem %s903_s5, 128  ;;  %s731_s27 = smov [#allocation2]  }
  0x57   : > { %p627_p6 = scmp.ne.s32.totalorder %s903_s5, %s626_s18  ;;  %s631_s30 = sshll.u32 %s731_s27, 4  ;;  %s632_s30 = int_to_ptr.vmem [resolvable:$false] %s631_s30 }
  0x58   : > { %s633_s21 = scalar_lea.vmem %s632_s30, 256  ;;  %p634_p5 = scmp.lt.s32.totalorder %s903_s5, %s632_s30 }
  0x59   : > { %p629_p12 = pnand %p627_p6, %p613_p3  ;;  %p635_p10 = scmp.lt.s32.totalorder %s633_s21, %s626_s18 }
  0x5b   : > { %p630_p0 = pneg %p629_p12  ;;  %p636_p13 = por %p635_p10, %p634_p5 }
  0x5d   : > { %p637_p9 = pnand %p636_p13, %p630_p0 }
  0x5f   : > { %640 = shalt.err (!%p637_p9)
}
  0x60   : > { %486 = dma.hbm_to_vmem [thread:$0]  (!%p899_p11), %s895_s4, 128, %s903_s5, %s171_s26  }
  0x61   : > { %p1019_p7 = scmp.ne.s32.totalorder %s1014_s24, 0 }
  0x62   : > { %s933_s7 = sand.u32 (!%p1019_p7), 1, %s711_s13   ;;  %p1020_p3 = scmp.ne.s32.totalorder (!%p1019_p7), %s1012_s22, 0 }
  0x63   : > { %193 = sbr.rel (%p1019_p7) target bundleno = 262 (0x106), region = 32  ;;  %s453_s8 = sshll.u32 (!%p1019_p7), %s933_s7, 3 }
  0x64   : > { %s196_s10 = scalar_lea.sflag (!%p1019_p7), [#allocation3], %s933_s7  ;;  %s199_s11 = scalar_lea.vmem (!%p1019_p7), [#allocation2], %s453_s8 }
  0x6a   : > { %694 = dma.done.wait (%p1020_p3), %s196_s10, 128  }
  0x6b   : > { %696 = vsyncadd (%p1020_p3), %s196_s10, 4294967168  ;;  %p1021_p11 = scmp.ne.s32.totalorder %s1010_s20, 0 }
  0x6d   : > { %698 = dma.done.wait (%p1021_p11), [#allocation6], 128  }
  0x6e   : > { %700 = vsyncadd (%p1021_p11), [#allocation6], 4294967168  ;;  %v732_v0 = vmov 0   ;;  %v284_v1 = vld [vmem:[#allocation5] sm:$0xf]  ;;  %v232_v3 = vld [vmem:[%s199_s11] sm:$0xff]  ;;  %v303_v49 = vlaneseq }
  0x6f   : > { %549 = vset.pattern.permute.xlu0 %v732_v0  ;;  %v285_v2 = vld [vmem:[#allocation7] sm:$0xf]  ;;  %vm236_vm0 = vcmask 1043456   ;;  %v234_v4 = vcombine.high %v232_v3, %v232_v3  ;;  %v254_v5 = vmul.f32 %v232_v3, %v232_v3  ;;  %v733_v47 = vmov 839922192   ;;  %s463_s20 = sshll.u32 %s719_s15, 7 }
  0x70   : > { %298 = vperm.xlu0 %549, %v284_v1   ;;  %v237_v6 = vsel %vm236_vm0, %v232_v3, 0.0  ;;  %v301_v48 = vunpack.c.l.s4 %v733_v47  ;;  %v304_v52 = vshrl.u32 %v303_v49, 7  ;;  %s229_s22 = scalar_lea.vmem [#allocation8], %s453_s8  ;;  %s953_s6 = scalar_lea.hbm %s1005_s3, %s463_s20 }
  0x71   : > { %v244_v7 = vsel %vm236_vm0, %v234_v4, 0.0  ;;  %v256_v8 = vcombine.high %v254_v5, %v254_v5  ;;  %v238_v9 = vrot.slane %v237_v6, 4  ;;  %v258_v11 = vsel %vm236_vm0, %v254_v5, 0.0  ;;  %s340_s24 = sshll.u32 %s229_s22, 4  ;;  %s324_s26 = scalar_lea.sflag [#allocation4], %s933_s7  ;;  %s955_s24 = int_to_ptr.vmem [resolvable:$true] %s340_s24 }
  0x72   : > { %v245_v10 = vrot.slane %v244_v7, 4  ;;  %v259_v14 = vrot.slane %v258_v11, 4  ;;  %v302_v51 = vunpack.c.0.s8 %v301_v48  ;;  %s641_s28 = scalar_lea.vmem %s955_s24, 128  ;;  %s734_s15 = smov [#allocation8]  }
  0x73   : > { %v265_v12 = vsel %vm236_vm0, %v256_v8, 0.0  ;;  %v239_v13 = vadd.f32 %v238_v9, %v237_v6  ;;  %p642_p1 = scmp.ne.s32.totalorder %s955_s24, %s641_s28  ;;  %s645_s19 = sshll.u32 %s734_s15, 4  ;;  %s646_s19 = int_to_ptr.vmem [resolvable:$false] %s645_s19 }
  0x74   : > { %311 = vperm.xlu0 %549, %v285_v2   ;;  %v246_v15 = vadd.f32 %v245_v10, %v244_v7  ;;  %v266_v16 = vrot.slane %v265_v12, 4  ;;  %v260_v18 = vadd.f32 %v259_v14, %v258_v11  ;;  %v305_v55 = vsub.s32 %v302_v51, %v304_v52  ;;  %s647_s18 = scalar_lea.vmem %s646_s19, 256  ;;  %p648_p6 = scmp.lt.s32.totalorder %s955_s24, %s646_s19 }
  0x75   : > { %v240_v17 = vrot.slane %v239_v13, 2  ;;  %p643_p4 = pnand %p642_p1, %p881_p8  ;;  %p649_p12 = scmp.lt.s32.totalorder %s647_s18, %s641_s28 }
  0x76   : > { %v247_v19 = vrot.slane %v246_v15, 2  ;;  %v267_v20 = vadd.f32 %v266_v16, %v265_v12  ;;  %v261_v22 = vrot.slane %v260_v18, 2 }
  0x77   : > { %v241_v21 = vadd.f32 %v240_v17, %v239_v13  ;;  %p644_p2 = pneg %p643_p4  ;;  %p650_p0 = por %p649_p12, %p648_p6 }
  0x78   : > { %v248_v23 = vadd.f32 %v247_v19, %v246_v15  ;;  %v268_v24 = vrot.slane %v267_v20, 2  ;;  %v262_v26 = vadd.f32 %v261_v22, %v260_v18 }
  0x79   : > { %v242_v25 = vrot.slane %v241_v21, 1  ;;  %p651_p5 = pnand %p650_p0, %p644_p2 }
  0x7a   : > { %v249_v27 = vrot.slane %v248_v23, 1  ;;  %v269_v28 = vadd.f32 %v268_v24, %v267_v20  ;;  %v263_v30 = vrot.slane %v262_v26, 1 }
  0x7b   : > { %v243_v29 = vadd.f32 %v242_v25, %v241_v21 }
  0x7c   : > { %v250_v31 = vadd.f32 %v249_v27, %v248_v23  ;;  %v270_v32 = vrot.slane %v269_v28, 1  ;;  %v264_v34 = vadd.f32 %v263_v30, %v262_v26 }
  0x7d   : > { %v252_v33 = vmul.f32 0.25, %v243_v29 }
  0x7e   : > { %v253_v35 = vmul.f32 0.25, %v250_v31  ;;  %v271_v36 = vadd.f32 %v270_v32, %v269_v28  ;;  %v272_v37 = vmul.f32 0.25, %v264_v34 }
  0x7f   : > { %v274_v38 = vmul.f32 %v252_v33, %v252_v33 }
  0x80   : > { %v273_v39 = vmul.f32 0.25, %v271_v36  ;;  %v275_v40 = vmul.f32 %v253_v35, %v253_v35  ;;  %v288_v53 = vcombine.low %v252_v33, %v253_v35 }
  0x81   : > { %v276_v41 = vsub.f32 %v272_v37, %v274_v38 }
  0x82   : > { %v277_v42 = vsub.f32 %v273_v39, %v275_v40  ;;  %v290_v56 = vsub.f32 %v232_v3, %v288_v53 }
  0x83   : > { %v278_v43 = vmax.f32 %v276_v41, 0.0 }
  0x84   : > { %v279_v44 = vmax.f32 %v277_v42, 0.0 }
  0x85   : > { %v280_v45 = vadd.f32 1e-05, %v278_v43 }
  0x86   : > { %v281_v46 = vadd.f32 1e-05, %v279_v44 }
  0x87   : > { %551 = vrsqrt.f32 %v280_v45 }
  0x88   : > { %553 = vrsqrt.f32 %v281_v46 }
  0x91   : > { %v552_v50 = vpop.eup %551 }
  0x92   : > { %v554_v54 = vpop.eup %553 }
  0x93   : > { %v293_v57 = vcombine.low %v552_v50, %v554_v54 }
  0x95   : > { %v295_v59 = vmul.f32 %v293_v57, %v290_v56 }
  0xef   : > { %v299_v58 = vpop.permute.xlu0 %298 }
  0xf0   : > { %v306_v60 = vrot.slane %v299_v58, %v305_v55 }
  0xf2   : > { %v308_v62 = vmul.f32 %v306_v60, %v295_v59 }
  0xf3   : > { %v312_v61 = vpop.permute.xlu0 %311 }
  0xf4   : > { %v319_v63 = vrot.slane %v312_v61, %v305_v55 }
  0xf6   : > { %v321_v0 = vadd.f32 %v319_v63, %v308_v62 }
  0xf8   : > { %322 = vst [vmem:[%s229_s22] sm:$0xff] %v321_v0 }
  0xf9   : > { %654 = shalt.err (!%p651_p5)
}
  0xfa   : > { %s655_s27 = scalar_lea.hbm %s953_s6, 128  ;;  %s659_s7 = scalar_lea.hbm %s1005_s3, 256 }
  0xfb   : > { %p656_p10 = scmp.ne.s32.totalorder %s953_s6, %s655_s27  ;;  %p660_p7 = scmp.lt.u32.totalorder %s953_s6, %s1005_s3 }
  0xfc   : > { %p661_p3 = scmp.lt.u32.totalorder %s659_s7, %s655_s27  ;;  %p663_p1 = scmp.lt.u32.totalorder %s655_s27, %s953_s6 }
  0xfd   : > { %p657_p13 = pnand %p656_p10, %p881_p8 }
  0xfe   : > { %p662_p11 = por %p661_p3, %p660_p7 }
  0xff   : > { %p658_p9 = pneg %p657_p13 }
 0x100   : > { %p664_p4 = por %p663_p1, %p662_p11 }
 0x102   : > { %p665_p2 = pnand %p664_p4, %p658_p9 }
 0x104   : > { %668 = shalt.err (!%p665_p2)
}
 0x105   : > { %474 = dma.vmem_to_hbm [thread:$0]  (%p881_p8), %s955_s24, 128, %s953_s6, %s324_s26  }
 0x106 PF: > { %s352_s11 = sand.u32 1, %s707_s12   ;;  %p1022_p6 = scmp.ne.s32.totalorder %s1013_s23, 0 }
 0x107   : > { %p1023_p12 = scmp.ge.s32.totalorder %s727_s17, 2  ;;  %s353_s20 = scalar_lea.sflag [#allocation4], %s352_s11 }
 0x109   : > { %p488_p0 = pnand %p1023_p12, %p1022_p6 }
 0x10b   : > { %702 = dma.done.wait (!%p488_p0), %s353_s20, 128  }
 0x10c   : > { %704 = vsyncadd (!%p488_p0), %s353_s20, 4294967168  ;;  %s20_s17 = sadd.s32 1, %s727_s17   ;;  %s1024_s12 = smov %s711_s13 }
 0x10d   : > { %p17_p5 = scmp.ge.s32.totalorder %s20_s17, 4   ;;  %s1025_s13 = smov %s715_s14 }
 0x10e   : > { %s1026_s14 = smov %s890_s25  ;;  %s1027_s15 = smov %s723_s16 }
 0x10f   : > { %s1028_s16 = smov %s1030_s9  ;;  %19 = sbr.rel (!%p17_p5) target bundleno = 7 (0x7), region = 85 }
 0x116   :  { %358 = vsyncpa [#allocation3], 1 }
 0x117   :  { %360 = vsyncpa [#allocation3 + $0x1], 1 }
 0x118   :  { %361 = vsyncpa [#allocation6], 1 }
 0x119   :  { %362 = vsyncpa [#allocation4], 1 }
 0x11a   :  { %364 = vsyncpa [#allocation4 + $0x1], 1 }

</bundles_post_ra>
